<compile_context>
chip_gen: v7x
topology: tpu7x:2x2x1
jax: 0.10.0
libtpu: 0.0.40
codegen_flags: <defaults>
</compile_context>

<pallas_src>
import functools

import jax
import jax.numpy as jnp
from jax import lax
from jax.experimental import pallas as pl
from jax.experimental.pallas import tpu as pltpu


def _round_up(x, m):
    return ((x + m - 1) // m) * m


def _cdiv(a, b):
    return -(-a // b)


def actor_gaussian_kernel(s_ref, w1t_ref, b1_ref, w2t_ref, b2_ref,
                          w3t_ref, b3_ref, o_ref, *, max_action):
    """Fused 3-layer MLP for one batch tile, computed in (feature, batch).

    s_ref   : (TILE_B, S)   batch tile of states (pipelined over the grid)
    w*t_ref : (out, in)     VMEM-resident weights (PyTorch layout)
    b*_ref  : (out, 1)      VMEM-resident biases
    o_ref   : (A, TILE_B)   mean, batch on lanes (lane-dense stores)
    """
    s = s_ref[...]                                       # (TILE_B, S)

    # h1_t[h, b] = tanh( sum_s W1[h, s] * s[b, s] + b1[h] )   -> (H, TILE_B)
    z1 = lax.dot_general(
        w1t_ref[...], s,
        dimension_numbers=(((1,), (1,)), ((), ())),
        preferred_element_type=jnp.float32)
    h1_t = jnp.tanh(z1 + b1_ref[...])

    # h2_t = tanh( W2 @ h1_t + b2 )                            -> (H, TILE_B)
    z2 = lax.dot_general(
        w2t_ref[...], h1_t,
        dimension_numbers=(((1,), (0,)), ((), ())),
        preferred_element_type=jnp.float32)
    h2_t = jnp.tanh(z2 + b2_ref[...])

    # mean_t = max_action * tanh( W3 @ h2_t + b3 )             -> (A, TILE_B)
    z3 = lax.dot_general(
        w3t_ref[...], h2_t,
        dimension_numbers=(((1,), (0,)), ((), ())),
        preferred_element_type=jnp.float32)
    o_ref[...] = (max_action * jnp.tanh(z3 + b3_ref[...])).astype(o_ref.dtype)


def actor_gaussian_forward(s, params, max_action, *, tile_b=8192):
    """Batch-tiled pallas_call; weights resident, state/output pipelined."""
    w1t, b1, w2t, b2, w3t, b3 = params
    B, S = s.shape
    H = w1t.shape[0]
    A = w3t.shape[0]

    # ---- Tile selection: few, large tiles (amortize ~0.35us/grid-step). ----
    # For B >= 2048 force >= 2 tiles so v7x's two TensorCores both get work
    # (one extra step is noise on single-TC v5e/v6e).
    n_tiles = max(1, _cdiv(B, tile_b))
    if B >= 2048:
        n_tiles = max(n_tiles, 2)

    if n_tiles == 1:
        tb = B                       # block == full array dims -> no (8,128)
        b_pad = B                    # constraint, no padding needed
    else:
        # cdiv-balanced tiles, lane dim of the transposed output must be a
        # multiple of 128; power-of-two PPO batches need no padding.
        tb = _round_up(_cdiv(B, n_tiles), 128)
        b_pad = n_tiles * tb

    s_in = s if b_pad == B else jnp.pad(s, ((0, b_pad - B), (0, 0)))
    grid = (b_pad // tb,)

    kernel = functools.partial(actor_gaussian_kernel,
                               max_action=float(max_action))

    def resident(arr):
        # Same block every grid step -> DMA'd once, stays VMEM-resident.
        return pl.BlockSpec(arr.shape, lambda i: (0, 0))

    flops = 2 * b_pad * (S * H + H * H + H * A)
    transcendentals = b_pad * (2 * H + A)
    bytes_accessed = 4 * (b_pad * S + b_pad * A
                          + S * H + H * H + H * A + 2 * H + A)

    out_t = pl.pallas_call(
        kernel,
        out_shape=jax.ShapeDtypeStruct((A, b_pad), jnp.float32),
        grid=grid,
        in_specs=[
            pl.BlockSpec((tb, S), lambda i: (i, 0)),   # state tile, pipelined
            resident(w1t), resident(b1),
            resident(w2t), resident(b2),
            resident(w3t), resident(b3),
        ],
        out_specs=pl.BlockSpec((A, tb), lambda i: (0, i)),
        compiler_params=pltpu.CompilerParams(
            dimension_semantics=("parallel",),          # megacore on v7x
            vmem_limit_bytes=48 * 1024 * 1024),         # < v7x 64 MiB physical
        cost_estimate=pl.CostEstimate(
            flops=flops,
            transcendentals=transcendentals,
            bytes_accessed=bytes_accessed),
    )(s_in, w1t, b1, w2t, b2, w3t, b3)

    # (A, B_pad) -> (B, A): tiny layout-plumbing op outside the kernel.
    return out_t.T[:B]


def orthogonal(key, rows, cols, gain=1.0, dtype=jnp.float32):
    """Deterministic orthogonal init (mimics nn.init.orthogonal_)."""
    n = max(rows, cols)
    a = jax.random.normal(key, (n, n), dtype=jnp.float32)
    q, r = jnp.linalg.qr(a)
    d = jnp.diagonal(r)
    # copysign-style sign correction (never zeroes a column, unlike jnp.sign).
    q = q * jnp.where(d >= 0, 1.0, -1.0)
    return (gain * q[:rows, :cols]).astype(dtype)


def make_params(key, state_dim, hidden_width, action_dim):
    """Weights in PyTorch (out, in) layout, biases as (out, 1) columns."""
    k1, k2, k3 = jax.random.split(key, 3)
    w1t = orthogonal(k1, hidden_width, state_dim, gain=1.0)    # (H, S)
    w2t = orthogonal(k2, hidden_width, hidden_width, gain=1.0) # (H, H)
    w3t = orthogonal(k3, action_dim, hidden_width, gain=0.01)  # (A, H)
    b1 = jnp.zeros((hidden_width, 1), jnp.float32)
    b2 = jnp.zeros((hidden_width, 1), jnp.float32)
    b3 = jnp.zeros((action_dim, 1), jnp.float32)
    return (w1t, b1, w2t, b2, w3t, b3)


if __name__ == "__main__":
    config = dict(state_dim=16, hidden_width=32, action_dim=8,
                  max_action=2.0, use_tanh=1, use_orthogonal_init=True)

    key = jax.random.PRNGKey(0)
    k_params, k_s1, k_s2 = jax.random.split(key, 3)
    params = make_params(k_params, config["state_dim"],
                         config["hidden_width"], config["action_dim"])

    def reference(s):
        w1t, b1, w2t, b2, w3t, b3 = params
        h1 = jnp.tanh(s @ w1t.T + b1.T)
        h2 = jnp.tanh(h1 @ w2t.T + b2.T)
        return config["max_action"] * jnp.tanh(h2 @ w3t.T + b3.T)

    # Small single-tile case (grid = 1, block == full array dims).
    s_small = jax.random.normal(k_s1, (8, config["state_dim"]), jnp.float32)
    out_small = actor_gaussian_forward(s_small, params, config["max_action"])
    jax.block_until_ready(out_small)
    assert out_small.shape == (8, config["action_dim"])
    assert jnp.allclose(out_small, reference(s_small), atol=1e-5, rtol=1e-5)

    # Multi-tile case exercising the pipelined / megacore-parallel batch grid.
    s_big = jax.random.normal(k_s2, (256, config["state_dim"]), jnp.float32)
    out_big = actor_gaussian_forward(s_big, params, config["max_action"],
                                     tile_b=128)
    jax.block_until_ready(out_big)
    assert out_big.shape == (256, config["action_dim"])
    assert jnp.allclose(out_big, reference(s_big), atol=1e-5, rtol=1e-5)

    print("KERNEL_OK")
</pallas_src>

<mosaic_0001>
module attributes {stable_mosaic.version = 11 : i64} {
  func.func @actor_gaussian_kernel(%arg0: i32, %arg1: memref<8x16xf32, #tpu.memory_space<vmem>>, %arg2: memref<32x16xf32, #tpu.memory_space<vmem>>, %arg3: memref<32x1xf32, #tpu.memory_space<vmem>>, %arg4: memref<32x32xf32, #tpu.memory_space<vmem>>, %arg5: memref<32x1xf32, #tpu.memory_space<vmem>>, %arg6: memref<8x32xf32, #tpu.memory_space<vmem>>, %arg7: memref<8x1xf32, #tpu.memory_space<vmem>>, %arg8: memref<8x8xf32, #tpu.memory_space<vmem>>) attributes {dimension_semantics = [#tpu.dimension_semantics<parallel>], iteration_bounds = array<i64: 1>, scalar_prefetch = 0 : i64, scratch_operands = 0 : i64, tpu.core_type = #tpu.core_type<tc>, window_params = [{transform_indices = @transform_0, window_bounds = array<i64: 8, 16>}, {pipeline_mode = #tpu.pipeline_mode<synchronous>, transform_indices = @transform_1, window_bounds = array<i64: 32, 16>}, {pipeline_mode = #tpu.pipeline_mode<synchronous>, transform_indices = @transform_2, window_bounds = array<i64: 32, 1>}, {pipeline_mode = #tpu.pipeline_mode<synchronous>, transform_indices = @transform_3, window_bounds = array<i64: 32, 32>}, {pipeline_mode = #tpu.pipeline_mode<synchronous>, transform_indices = @transform_4, window_bounds = array<i64: 32, 1>}, {pipeline_mode = #tpu.pipeline_mode<synchronous>, transform_indices = @transform_5, window_bounds = array<i64: 8, 32>}, {pipeline_mode = #tpu.pipeline_mode<synchronous>, transform_indices = @transform_6, window_bounds = array<i64: 8, 1>}, {transform_indices = @transform_7, window_bounds = array<i64: 8, 8>}]} {
    %c0 = arith.constant 0 : index
    %c0_0 = arith.constant 0 : index
    %0 = vector.load %arg1[%c0, %c0_0] : memref<8x16xf32, #tpu.memory_space<vmem>>, vector<8x16xf32>
    %c0_1 = arith.constant 0 : index
    %c0_2 = arith.constant 0 : index
    %1 = vector.load %arg2[%c0_1, %c0_2] : memref<32x16xf32, #tpu.memory_space<vmem>>, vector<32x16xf32>
    %cst = arith.constant dense<0.000000e+00> : vector<32x8xf32>
    %2 = tpu.matmul %1, %0, %cst {dimension_numbers = #tpu.dot_dimension_numbers<[1], [1], [0], [0], [0, 0, 1, 0], [], []>} : vector<32x16xf32>, vector<8x16xf32>, vector<32x8xf32> -> vector<32x8xf32>
    %c0_3 = arith.constant 0 : index
    %c0_4 = arith.constant 0 : index
    %3 = vector.load %arg3[%c0_3, %c0_4] : memref<32x1xf32, #tpu.memory_space<vmem>>, vector<32x1xf32>
    %4 = vector.broadcast %3 : vector<32x1xf32> to vector<32x8xf32>
    %5 = arith.addf %2, %4 : vector<32x8xf32>
    %6 = math.tanh %5 : vector<32x8xf32>
    %c0_5 = arith.constant 0 : index
    %c0_6 = arith.constant 0 : index
    %7 = vector.load %arg4[%c0_5, %c0_6] : memref<32x32xf32, #tpu.memory_space<vmem>>, vector<32x32xf32>
    %cst_7 = arith.constant dense<0.000000e+00> : vector<32x8xf32>
    %8 = tpu.matmul %7, %6, %cst_7 {dimension_numbers = #tpu.dot_dimension_numbers<[1], [0], [0], [1], [0, 0, 1, 1], [], []>} : vector<32x32xf32>, vector<32x8xf32>, vector<32x8xf32> -> vector<32x8xf32>
    %c0_8 = arith.constant 0 : index
    %c0_9 = arith.constant 0 : index
    %9 = vector.load %arg5[%c0_8, %c0_9] : memref<32x1xf32, #tpu.memory_space<vmem>>, vector<32x1xf32>
    %10 = vector.broadcast %9 : vector<32x1xf32> to vector<32x8xf32>
    %11 = arith.addf %8, %10 : vector<32x8xf32>
    %12 = math.tanh %11 : vector<32x8xf32>
    %c0_10 = arith.constant 0 : index
    %c0_11 = arith.constant 0 : index
    %13 = vector.load %arg6[%c0_10, %c0_11] : memref<8x32xf32, #tpu.memory_space<vmem>>, vector<8x32xf32>
    %cst_12 = arith.constant dense<0.000000e+00> : vector<8x8xf32>
    %14 = tpu.matmul %13, %12, %cst_12 {dimension_numbers = #tpu.dot_dimension_numbers<[1], [0], [0], [1], [0, 0, 1, 1], [], []>} : vector<8x32xf32>, vector<32x8xf32>, vector<8x8xf32> -> vector<8x8xf32>
    %c0_13 = arith.constant 0 : index
    %c0_14 = arith.constant 0 : index
    %15 = vector.load %arg7[%c0_13, %c0_14] : memref<8x1xf32, #tpu.memory_space<vmem>>, vector<8x1xf32>
    %16 = vector.broadcast %15 : vector<8x1xf32> to vector<8x8xf32>
    %17 = arith.addf %14, %16 : vector<8x8xf32>
    %18 = math.tanh %17 : vector<8x8xf32>
    %cst_15 = arith.constant 2.000000e+00 : f32
    %19 = vector.broadcast %cst_15 : f32 to vector<8x8xf32>
    %20 = arith.mulf %19, %18 : vector<8x8xf32>
    %c0_16 = arith.constant 0 : index
    %c0_17 = arith.constant 0 : index
    %21 = vector.load %arg8[%c0_16, %c0_17] : memref<8x8xf32, #tpu.memory_space<vmem>>, vector<8x8xf32>
    tpu.vector_store %arg8[%c0_16, %c0_17], %20 {strides = array<i32>} : memref<8x8xf32, #tpu.memory_space<vmem>>, vector<8x8xf32>,
    return
  }
  func.func @transform_0(%arg0: i32) -> (i32, i32) {
    %c0_i32 = arith.constant 0 : i32
    %c0_i32_0 = arith.constant 0 : i32
    return %arg0, %c0_i32 : i32, i32
  }
  func.func @transform_1(%arg0: i32) -> (i32, i32) {
    %c0_i32 = arith.constant 0 : i32
    %c0_i32_0 = arith.constant 0 : i32
    %c0_i32_1 = arith.constant 0 : i32
    return %c0_i32, %c0_i32_0 : i32, i32
  }
  func.func @transform_2(%arg0: i32) -> (i32, i32) {
    %c0_i32 = arith.constant 0 : i32
    %c0_i32_0 = arith.constant 0 : i32
    %c0_i32_1 = arith.constant 0 : i32
    return %c0_i32, %c0_i32_0 : i32, i32
  }
  func.func @transform_3(%arg0: i32) -> (i32, i32) {
    %c0_i32 = arith.constant 0 : i32
    %c0_i32_0 = arith.constant 0 : i32
    %c0_i32_1 = arith.constant 0 : i32
    return %c0_i32, %c0_i32_0 : i32, i32
  }
  func.func @transform_4(%arg0: i32) -> (i32, i32) {
    %c0_i32 = arith.constant 0 : i32
    %c0_i32_0 = arith.constant 0 : i32
    %c0_i32_1 = arith.constant 0 : i32
    return %c0_i32, %c0_i32_0 : i32, i32
  }
  func.func @transform_5(%arg0: i32) -> (i32, i32) {
    %c0_i32 = arith.constant 0 : i32
    %c0_i32_0 = arith.constant 0 : i32
    %c0_i32_1 = arith.constant 0 : i32
    return %c0_i32, %c0_i32_0 : i32, i32
  }
  func.func @transform_6(%arg0: i32) -> (i32, i32) {
    %c0_i32 = arith.constant 0 : i32
    %c0_i32_0 = arith.constant 0 : i32
    %c0_i32_1 = arith.constant 0 : i32
    return %c0_i32, %c0_i32_0 : i32, i32
  }
  func.func @transform_7(%arg0: i32) -> (i32, i32) {
    %c0_i32 = arith.constant 0 : i32
    %c0_i32_0 = arith.constant 0 : i32
    return %c0_i32, %arg0 : i32, i32
  }
}

</mosaic_0001>

<bundles_post_ra>
// kernel: tpu_custom_call.1
= control target key start
LH: loop header
LB: loop body
LE: loop exit
PB: predicated region body
PF: predicated region fallthrough
CT: control target
= control target key end

     0   :  { %vm56_vm0 = vcmask 130048   ;;  %v513_v4 = vmov 0   ;;  %s638_s0 = inlined_call_operand.vmem [shape: f32[8,16], index: 0, kind: input, shape index: {}]   ;;  %s639_s1 = inlined_call_operand.vmem [shape: f32[32,16], index: 1, kind: input, shape index: {}]   ;;  %s640_s2 = inlined_call_operand.vmem [shape: f32[32,1], index: 2, kind: input, shape index: {}]   ;;  %s641_s3 = inlined_call_operand.vmem [shape: f32[32,32], index: 3, kind: input, shape index: {}]   ;;  %s642_s4 = inlined_call_operand.vmem [shape: f32[32,1], index: 4, kind: input, shape index: {}]   ;;  %s643_s5 = inlined_call_operand.vmem [shape: f32[8,32], index: 5, kind: input, shape index: {}]   ;;  %s644_s6 = inlined_call_operand.vmem [shape: f32[8,1], index: 6, kind: input, shape index: {}]   ;;  %s645_s7 = inlined_call_operand.hbm [shape: f32[8,8], index: 7, kind: output, shape index: {}]  }
   0x1   :  { %v27_v0 = vld [vmem:[%s638_s0] sm:$0xff]  ;;  %v29_v3 = vld [vmem:[%s639_s1 + $0x8] sm:$0xff]  ;;  %469 = vset.pattern.permute.xlu0 %v513_v4  ;;  %v34_v5 = vld [vmem:[%s640_s2 + $0x10] sm:$0xff]  ;;  %470 = vset.pattern.permute.xlu1 %v513_v4 }
   0x2   :  { %v28_v1 = vld [vmem:[%s639_s1] sm:$0xff]  ;;  %417 = vmatprep.subr.msk.mxu0 %vm56_vm0, %v27_v0  ;;  %v30_v6 = vld [vmem:[%s639_s1 + $0x10] sm:$0xff]  ;;  %v33_v7 = vld [vmem:[%s640_s2 + $0x8] sm:$0xff]  ;;  %48 = vperm.xlu1 %470, %v34_v5  }
   0x3   :  { %419 = vmatprep.mubr.msk.f32.mxu0 %vm56_vm0, %v28_v1  ;;  %v32_v2 = vld [vmem:[%s640_s2] sm:$0xff]  ;;  %418 = vmatpush3.xpose.msk.msra.mxu0 %vm56_vm0, %v27_v0 }
   0x4   :  { %38 = vperm.xlu0 %469, %v32_v2  }
   0x5   :  { %12 = vsyncpa [#allocation3], 0  ;;  %v35_v8 = vld [vmem:[%s640_s2 + $0x18] sm:$0xff]  ;;  %v165_v10 = vld [vmem:[%s642_s4] sm:$0xff]  ;;  %vm189_vm1 = vcmask 261120   ;;  %v514_v37 = vmov 0.0|0.0  }
   0x6   :  { %420 = vmatmul.mubr.msk.f32.vlgmr.msra.gmra.mrb[0].mxu0 %vm56_vm0, %v29_v3  ;;  %v31_v9 = vld [vmem:[%s639_s1 + $0x18] sm:$0xff]  ;;  %53 = vperm.xlu1 %470, %v35_v8   ;;  %v166_v11 = vld [vmem:[%s642_s4 + $0x8] sm:$0xff]  ;;  %v167_v12 = vld [vmem:[%s642_s4 + $0x10] sm:$0xff]  ;;  %vm515_vm2 = vmmov 0   ;;  %v516_v38 = vmov 0.0   ;;  %s517_s9 = smov [#allocation2]  }
   0x7   :  { %422 = vmatprep.mubr.msk.f32.mxu0 %vm56_vm0, %v30_v6  ;;  %v168_v13 = vld [vmem:[%s642_s4 + $0x18] sm:$0xff]  ;;  %v292_v14 = vld [vmem:[%s644_s6] sm:$0xff]  ;;  %v162_v34 = vld [vmem:[%s641_s3 + $0x8] sm:$0xff]  ;;  %458 = vmatprep.subr.bf16.mxu0 %v514_v37  ;;  %s381_s10 = sshll.u32 %s517_s9, 4  ;;  %vm373_vm3 = vcmask 64512   ;;  %s382_s10 = int_to_ptr.vmem [resolvable:$true] %s381_s10 }
   0x8   :  { %43 = vperm.xlu0 %469, %v33_v7   ;;  %v161_v15 = vld [vmem:[%s641_s3] sm:$0xff]  ;;  %v163_v35 = vld [vmem:[%s641_s3 + $0x10] sm:$0xff]  ;;  %v164_v36 = vld [vmem:[%s641_s3 + $0x18] sm:$0xff]  ;;  %s489_s11 = scalar_lea.vmem %s382_s10, 128  ;;  %p494_p1 = scmp.lt.s32.totalorder %s382_s10, %s382_s10 }
   0x9   :  { %433 = vmatprep.mubr.msk.f32.mxu1 %vm189_vm1, %v161_v15  ;;  %v291_v57 = vld [vmem:[%s643_s5] sm:$0xff]  ;;  %p490_p0 = scmp.ne.s32.totalorder %s382_s10, %s489_s11  ;;  %p495_p2 = scmp.lt.s32.totalorder %s489_s11, %s489_s11 }
   0xa   :  { %423 = vmatmul.mubr.msk.f32.gmra.mrb[2].mxu0 %vm56_vm0, %v31_v9  ;;  %176 = vperm.xlu1 %470, %v166_v11  }
   0xb   :  { %447 = vmatprep.mubr.msk.f32.mxu0 %vm515_vm2, %v516_v38  ;;  %p496_p3 = por %p495_p2, %p494_p1 }
   0xc   :  { %171 = vperm.xlu0 %469, %v165_v10  }
   0xd   :  { %p497_p4 = pnand %p496_p3, %p490_p0 }
   0xe   :  { %186 = vperm.xlu1 %470, %v168_v13  }
  0x10   :  { %181 = vperm.xlu0 %469, %v167_v12  }
  0x14   :  { %295 = vperm.xlu0 %469, %v292_v14  }
  0x81   :  { %v49_v17 = vpop.permute.xlu1 %48 }
  0x83   :  { %v39_v16 = vpop.permute.xlu0 %38 }
  0x85   :  { %v54_v23 = vpop.permute.xlu1 %53 }
  0x87   :  { %v44_v18 = vpop.permute.xlu0 %43 }
  0x89   :  { %v177_v39 = vpop.permute.xlu1 %176 }
  0x8b   :  { %v172_v40 = vpop.permute.xlu0 %171 }
  0x8d   :  { %v187_v45 = vpop.permute.xlu1 %186 }
  0x8f   :  { %v182_v47 = vpop.permute.xlu0 %181 }
  0x93   :  { %v296_v58 = vpop.permute.xlu0 %295 }
  0xd9   :  { %v421_v19 = vpop.f32.mrb[0].mxu0 }
  0xda   :  { %v144_v20 = vadd.f32 %v421_v19, %v44_v18  ;;  %v138_v21 = vpop.f32.mrb[1].mxu0 }
  0xdb   :  { %v139_v22 = vadd.f32 %v138_v21, %v39_v16 }
  0xdc   :  { %471 = vtanh.f32 %v144_v20 }
  0xdd   :  { %473 = vtanh.f32 %v139_v22  ;;  %v424_v24 = vpop.f32.mrb[2].mxu0 }
  0xde   :  { %v154_v25 = vadd.f32 %v424_v24, %v54_v23  ;;  %v148_v26 = vpop.f32.mrb[3].mxu0 }
  0xdf   :  { %v149_v27 = vadd.f32 %v148_v26, %v49_v17 }
  0xe0   :  { %475 = vtanh.f32 %v154_v25 }
  0xe1   :  { %477 = vtanh.f32 %v149_v27 }
  0xe6   :  { %v472_v28 = vpop.eup %471 }
  0xe7   :  { %v474_v29 = vpop.eup %473 }
  0xe8   :  { %v450_v30 = vpack.c.bf16 %v472_v28, %v474_v29 }
  0xea   :  { %v476_v31 = vpop.eup %475  ;;  %451 = vmatprep.subr.bf16.mxu1 %v450_v30 }
  0xeb   :  { %v478_v32 = vpop.eup %477  ;;  %453 = vmatpush3.bf16.msra.mxu1 %v450_v30 }
  0xec   :  { %v454_v33 = vpack.c.bf16 %v476_v31, %v478_v32 }
  0xee   :  { %455 = vmatprep.subr.bf16.mxu1 %v454_v33 }
  0xef   :  { %457 = vmatpush3.bf16.msra.mxu1 %v454_v33 }
  0xf2   :  { %434 = vmatmul.mubr.msk.f32.vlgmr.msra.gmra.mrb[0].mxu1 %vm189_vm1, %v162_v34 }
  0xf3   :  { %436 = vmatprep.mubr.msk.f32.mxu1 %vm189_vm1, %v163_v35 }
  0xf6   :  { %437 = vmatmul.mubr.msk.f32.gmra.mrb[2].mxu1 %vm189_vm1, %v164_v36 }
 0x1c5   :  { %v435_v41 = vpop.f32.mrb[0].mxu1 }
 0x1c6   :  { %v274_v42 = vadd.f32 %v435_v41, %v177_v39  ;;  %v268_v43 = vpop.f32.mrb[1].mxu1 }
 0x1c7   :  { %v269_v44 = vadd.f32 %v268_v43, %v172_v40 }
 0x1c8   :  { %479 = vtanh.f32 %v274_v42 }
 0x1c9   :  { %481 = vtanh.f32 %v269_v44  ;;  %v438_v46 = vpop.f32.mrb[2].mxu1 }
 0x1ca   :  { %v284_v48 = vadd.f32 %v438_v46, %v187_v45  ;;  %v278_v49 = vpop.f32.mrb[3].mxu1 }
 0x1cb   :  { %v279_v50 = vadd.f32 %v278_v49, %v182_v47 }
 0x1cc   :  { %483 = vtanh.f32 %v284_v48 }
 0x1cd   :  { %485 = vtanh.f32 %v279_v50 }
 0x1d2   :  { %v480_v51 = vpop.eup %479 }
 0x1d3   :  { %v482_v52 = vpop.eup %481 }
 0x1d4   :  { %v459_v53 = vpack.c.bf16 %v480_v51, %v482_v52 }
 0x1d6   :  { %v484_v54 = vpop.eup %483  ;;  %460 = vmatpush3.bf16.msra.mxu0 %v459_v53 }
 0x1d7   :  { %v486_v55 = vpop.eup %485  ;;  %461 = vmatprep.subr.bf16.mxu0 %v514_v37 }
 0x1d8   :  { %v462_v56 = vpack.c.bf16 %v484_v54, %v486_v55 }
 0x1da   :  { %463 = vmatpush3.bf16.msra.mxu0 %v462_v56 }
 0x1dd   :  { %448 = vmatmul.mubr.msk.f32.vlgmr.msra.gmra.mrb[4].mxu0 %vm189_vm1, %v291_v57 }
 0x2b0   :  { %v367_v59 = vpop.f32.mrb[4].mxu0 }
 0x2b1   :  { %v368_v60 = vadd.f32 %v367_v59, %v296_v58  ;;  %v449_v61 = vpop.f32.mrb[5].mxu0 }
 0x2b3   :  { %487 = vtanh.f32 %v368_v60 }
 0x2bd   :  { %v488_v62 = vpop.eup %487 }
 0x2be   :  { %v372_v63 = vmul.f32 2.0, %v488_v62 }
 0x2c0   :  { %374 = vst.msk [vmem:[#allocation2] sm:$0xff] %vm373_vm3, %v372_v63 }
 0x2c1   :  { %500 = shalt.err (!%p497_p4)
}
 0x2c2   :  { %s501_s13 = scalar_lea.hbm %s645_s7, 128 }
 0x2c3   :  { %p502_p5 = scmp.ne.s32.totalorder %s645_s7, %s501_s13  ;;  %p505_p6 = scmp.lt.u32.totalorder %s501_s13, %s645_s7 }
 0x2c5   :  { %p507_p7 = pnand %p505_p6, %p502_p5 }
 0x2c7   :  { %510 = shalt.err (!%p507_p7)
}
 0x2c8   :  { %384 = dma.vmem_to_hbm [thread:$0]  %s382_s10, 128, %s645_s7, [#allocation3]  }
 0x2c9   :  { %511 = dma.done.wait [#allocation3], 128  }
 0x2ca   :  { %512 = vsyncadd [#allocation3], 4294967168 }
 0x2cb   :  { %388 = vsyncpa [#allocation3], 1 }

</bundles_post_ra>
